<compile_context>
chip_gen: v7x
topology: tpu7x:2x2x1
jax: 0.10.0
libtpu: 0.0.40
codegen_flags: <defaults>
</compile_context>

<pallas_src>
import functools

import jax
import jax.numpy as jnp
from jax.experimental import pallas as pl
from jax.experimental.pallas import tpu as pltpu


def _round_up(v, m):
    return -(-v // m) * m


def _conv3x3_kernel(x_ref, w_ref, o_ref, *, wp, l_out):
    """One (batch, row-tile) grid step of the 3x3 conv.

    x_ref : (1, 1, C, L_in_pad)  bf16  halo-padded, flattened spatial slab
    w_ref : (2C, 9C)             bf16  tap columns ordered (kh, kw, ci)
    o_ref : (1, 1, 2C, l_out)    f32   flattened conv out; each output row has
                                       W+2 columns (last 2 are garbage, cropped
                                       in the wrapper)
    """
    xt = x_ref[0, 0]                                     # (C, L_in_pad) bf16
    # Tap (kh, kw) of output flat position q = r*wp + w is xt[:, q + kh*wp + kw].
    # Build all 9 taps with static lane-offset slices and stack along the
    # contraction dim -> a single lane-dense MXU matmul (K = 9C instead of
    # nine K = C matmuls).
    taps = jnp.concatenate(
        [xt[:, kh * wp + kw: kh * wp + kw + l_out]
         for kh in range(3) for kw in range(3)],
        axis=0)                                          # (9C, l_out) bf16
    o_ref[0, 0] = jnp.dot(w_ref[...], taps,
                          preferred_element_type=jnp.float32)


def upsample_pallas(x, weight, *, row_tile=None):
    """Conv2d(C -> 2C, 3x3, pad=1, no bias) + PixelShuffle(2).  NCHW in/out."""
    B, C, H, W = x.shape
    Cout = weight.shape[0]
    assert weight.shape == (2 * C, C, 3, 3)
    assert Cout % 4 == 0, "PixelShuffle(2) needs 2*n_feat divisible by 4"
    Wp = W + 2

    # Pick a row tile: largest divisor of H whose (double-buffered) blocks stay
    # well inside scoped VMEM.  Tiny shapes -> tH == H (single tile per batch).
    if row_tile is None:
        budget = 8 * 1024 * 1024
        row_tile = 1
        for cand in range(H, 0, -1):
            if H % cand:
                continue
            in_b = C * _round_up((cand + 2) * Wp + 2, 128) * 2
            out_b = Cout * cand * Wp * 4
            if 2 * (in_b + out_b) <= budget:
                row_tile = cand
                break
    tH = row_tile
    assert H % tH == 0
    nH = H // tH

    l_out = tH * Wp                        # flat output lanes per tile
    l_in = (tH + 2) * Wp + 2               # taps read up to 2*Wp+2 past l_out
    l_in_pad = _round_up(l_in, 128)

    # ---- glue (pure layout, stays in XLA): zero-pad spatially, cast bf16,
    #      build halo row-tiles, flatten spatial. ----
    xpad = jnp.pad(x, ((0, 0), (0, 0), (1, 1), (1, 1))).astype(jnp.bfloat16)
    tiles = jnp.stack(
        [xpad[:, :, i * tH: i * tH + tH + 2, :] for i in range(nH)], axis=1)
    tiles = tiles.reshape(B, nH, C, (tH + 2) * Wp)
    tiles = jnp.pad(
        tiles, ((0, 0), (0, 0), (0, 0), (0, l_in_pad - (tH + 2) * Wp)))

    # (2C, C, 3, 3) -> (2C, 9C) with columns ordered (kh, kw, ci), matching the
    # in-kernel tap stacking order.
    wflat = jnp.transpose(weight, (0, 2, 3, 1)).reshape(Cout, 9 * C)
    wflat = wflat.astype(jnp.bfloat16)

    flops = 2 * B * nH * Cout * (9 * C) * l_out
    bytes_accessed = (tiles.size * 2 + wflat.size * 2
                      + B * nH * Cout * l_out * 4)

    kernel = functools.partial(_conv3x3_kernel, wp=Wp, l_out=l_out)
    conv_flat = pl.pallas_call(
        kernel,
        out_shape=jax.ShapeDtypeStruct((B, nH, Cout, l_out), jnp.float32),
        grid_spec=pltpu.PrefetchScalarGridSpec(
            num_scalar_prefetch=0,
            grid=(B, nH),
            in_specs=[
                pl.BlockSpec((1, 1, C, l_in_pad), lambda b, i: (b, i, 0, 0)),
                pl.BlockSpec((Cout, 9 * C), lambda b, i: (0, 0)),
            ],
            out_specs=pl.BlockSpec((1, 1, Cout, l_out),
                                   lambda b, i: (b, i, 0, 0))),
        compiler_params=pltpu.CompilerParams(
            dimension_semantics=("parallel", "parallel"),
            vmem_limit_bytes=32 * 1024 * 1024),
        cost_estimate=pl.CostEstimate(flops=flops, transcendentals=0,
                                      bytes_accessed=bytes_accessed),
    )(tiles, wflat)

    # ---- un-tile and crop the 2 padded columns per row -> (B, 2C, H, W) ----
    y = conv_flat.reshape(B, nH, Cout, tH, Wp)
    y = jnp.transpose(y, (0, 2, 1, 3, 4)).reshape(B, Cout, H, Wp)[..., :W]

    # ---- PixelShuffle(2): (B, 2C, H, W) -> (B, C//2, 2H, 2W) ----
    # TODO(synk): PixelShuffle is a pure channel->space layout rearrangement;
    # it is left to XLA here rather than fused into the kernel's store pattern.
    r = 2
    Cs = Cout // (r * r)
    y = y.reshape(B, Cs, r, r, H, W)
    y = jnp.transpose(y, (0, 1, 4, 2, 5, 3)).reshape(B, Cs, H * r, W * r)
    return y


def upsample_reference(x, weight):
    """Plain-JAX reference: lax.conv (HIGHEST precision) + PixelShuffle(2)."""
    y = jax.lax.conv_general_dilated(
        x, weight, window_strides=(1, 1), padding=[(1, 1), (1, 1)],
        dimension_numbers=("NCHW", "OIHW", "NCHW"),
        precision=jax.lax.Precision.HIGHEST)
    B, C2, H, W = y.shape
    r = 2
    Cs = C2 // (r * r)
    y = y.reshape(B, Cs, r, r, H, W)
    y = jnp.transpose(y, (0, 1, 4, 2, 5, 3)).reshape(B, Cs, H * r, W * r)
    return y


if __name__ == "__main__":
    B, n_feat, H, W = 2, 4, 16, 16
    k_x, k_w = jax.random.split(jax.random.PRNGKey(0))
    x = jax.random.normal(k_x, (B, n_feat, H, W), jnp.float32)
    weight = 0.2 * jax.random.normal(
        k_w, (2 * n_feat, n_feat, 3, 3), jnp.float32)

    # row_tile=8 -> grid (2, 2): exercises the row-tiled path and provides four
    # independent "parallel" steps (enough to feed v7x's two TensorCores).
    out = jax.block_until_ready(upsample_pallas(x, weight, row_tile=8))

    # The kernel uses bf16 MXU operands with f32 accumulation; compare against
    # a reference fed the same bf16-rounded inputs so the check isolates the
    # kernel's math (tight tolerance) rather than bf16 input rounding.
    x_bf = x.astype(jnp.bfloat16).astype(jnp.float32)
    w_bf = weight.astype(jnp.bfloat16).astype(jnp.float32)
    ref = jax.block_until_ready(upsample_reference(x_bf, w_bf))

    assert out.shape == (B, n_feat // 2, 2 * H, 2 * W), out.shape
    max_err = float(jnp.max(jnp.abs(out - ref)))
    assert max_err < 2e-3, f"mismatch vs reference: {max_err}"
    print("KERNEL_OK")
</pallas_src>

<mosaic_0001>
module attributes {stable_mosaic.version = 11 : i64} {
  func.func @_conv3x3_kernel(%arg0: i32, %arg1: i32, %arg2: memref<1x1x4x256xbf16, #tpu.memory_space<vmem>>, %arg3: memref<8x36xbf16, #tpu.memory_space<vmem>>, %arg4: memref<1x1x8x144xf32, #tpu.memory_space<vmem>>) attributes {dimension_semantics = [#tpu.dimension_semantics<parallel>, #tpu.dimension_semantics<parallel>], iteration_bounds = array<i64: 2, 2>, scalar_prefetch = 0 : i64, scratch_operands = 0 : i64, tpu.core_type = #tpu.core_type<tc>, window_params = [{transform_indices = @transform_0, window_bounds = array<i64: 1, 1, 4, 256>}, {pipeline_mode = #tpu.pipeline_mode<synchronous>, transform_indices = @transform_1, window_bounds = array<i64: 8, 36>}, {transform_indices = @transform_2, window_bounds = array<i64: 1, 1, 8, 144>}]} {
    %c0 = arith.constant 0 : index
    %c0_0 = arith.constant 0 : index
    %c0_1 = arith.constant 0 : index
    %c0_2 = arith.constant 0 : index
    %0 = vector.load %arg2[%c0, %c0_0, %c0_1, %c0_2] : memref<1x1x4x256xbf16, #tpu.memory_space<vmem>>, vector<1x1x4x256xbf16>
    %1 = vector.shape_cast %0 : vector<1x1x4x256xbf16> to vector<4x256xbf16>
    %2 = vector.extract_strided_slice %1 {offsets = [0, 0], sizes = [4, 144], strides = [1, 1]} : vector<4x256xbf16> to vector<4x144xbf16>
    %3 = vector.extract_strided_slice %1 {offsets = [0, 1], sizes = [4, 144], strides = [1, 1]} : vector<4x256xbf16> to vector<4x144xbf16>
    %4 = vector.extract_strided_slice %1 {offsets = [0, 2], sizes = [4, 144], strides = [1, 1]} : vector<4x256xbf16> to vector<4x144xbf16>
    %5 = vector.extract_strided_slice %1 {offsets = [0, 18], sizes = [4, 144], strides = [1, 1]} : vector<4x256xbf16> to vector<4x144xbf16>
    %6 = vector.extract_strided_slice %1 {offsets = [0, 19], sizes = [4, 144], strides = [1, 1]} : vector<4x256xbf16> to vector<4x144xbf16>
    %7 = vector.extract_strided_slice %1 {offsets = [0, 20], sizes = [4, 144], strides = [1, 1]} : vector<4x256xbf16> to vector<4x144xbf16>
    %8 = vector.extract_strided_slice %1 {offsets = [0, 36], sizes = [4, 144], strides = [1, 1]} : vector<4x256xbf16> to vector<4x144xbf16>
    %9 = vector.extract_strided_slice %1 {offsets = [0, 37], sizes = [4, 144], strides = [1, 1]} : vector<4x256xbf16> to vector<4x144xbf16>
    %10 = vector.extract_strided_slice %1 {offsets = [0, 38], sizes = [4, 144], strides = [1, 1]} : vector<4x256xbf16> to vector<4x144xbf16>
    %11 = tpu.concatenate %2, %3, %4, %5, %6, %7, %8, %9, %10 in 0 : vector<4x144xbf16>, vector<4x144xbf16>, vector<4x144xbf16>, vector<4x144xbf16>, vector<4x144xbf16>, vector<4x144xbf16>, vector<4x144xbf16>, vector<4x144xbf16>, vector<4x144xbf16> -> vector<36x144xbf16>
    %c0_3 = arith.constant 0 : index
    %c0_4 = arith.constant 0 : index
    %12 = vector.load %arg3[%c0_3, %c0_4] : memref<8x36xbf16, #tpu.memory_space<vmem>>, vector<8x36xbf16>
    %cst = arith.constant dense<0.000000e+00> : vector<8x144xf32>
    %13 = tpu.matmul %12, %11, %cst {dimension_numbers = #tpu.dot_dimension_numbers<[1], [0], [0], [1], [0, 0, 1, 1], [], []>} : vector<8x36xbf16>, vector<36x144xbf16>, vector<8x144xf32> -> vector<8x144xf32>
    %c0_5 = arith.constant 0 : index
    %c0_6 = arith.constant 0 : index
    %c0_7 = arith.constant 0 : index
    %c0_8 = arith.constant 0 : index
    %14 = vector.load %arg4[%c0_5, %c0_6, %c0_7, %c0_8] : memref<1x1x8x144xf32, #tpu.memory_space<vmem>>, vector<1x1x8x144xf32>
    %15 = vector.shape_cast %14 : vector<1x1x8x144xf32> to vector<8x144xf32>
    %16 = vector.shape_cast %13 : vector<8x144xf32> to vector<1x1x8x144xf32>
    tpu.vector_store %arg4[%c0_5, %c0_6, %c0_7, %c0_8], %16 {strides = array<i32>} : memref<1x1x8x144xf32, #tpu.memory_space<vmem>>, vector<1x1x8x144xf32>,
    return
  }
  func.func @transform_0(%arg0: i32, %arg1: i32) -> (i32, i32, i32, i32) {
    %c0_i32 = arith.constant 0 : i32
    %c0_i32_0 = arith.constant 0 : i32
    %c0_i32_1 = arith.constant 0 : i32
    return %arg0, %arg1, %c0_i32, %c0_i32_0 : i32, i32, i32, i32
  }
  func.func @transform_1(%arg0: i32, %arg1: i32) -> (i32, i32) {
    %c0_i32 = arith.constant 0 : i32
    %c0_i32_0 = arith.constant 0 : i32
    %c0_i32_1 = arith.constant 0 : i32
    return %c0_i32, %c0_i32_0 : i32, i32
  }
  func.func @transform_2(%arg0: i32, %arg1: i32) -> (i32, i32, i32, i32) {
    %c0_i32 = arith.constant 0 : i32
    %c0_i32_0 = arith.constant 0 : i32
    %c0_i32_1 = arith.constant 0 : i32
    return %arg0, %arg1, %c0_i32, %c0_i32_0 : i32, i32, i32, i32
  }
}

</mosaic_0001>

<bundles_post_ra>
// kernel: tpu_custom_call.1
= control target key start
LH: loop header
LB: loop body
LE: loop exit
PB: predicated region body
PF: predicated region fallthrough
CT: control target
= control target key end

     0   :  { %s1029_s0 = inlined_call_operand.hbm [shape: bf16[2,2,4,256], index: 0, kind: input, shape index: {}]   ;;  %s1030_s1 = inlined_call_operand.hbm [shape: bf16[8,36], index: 1, kind: input, shape index: {}]   ;;  %s1031_s2 = inlined_call_operand.hbm [shape: f32[2,2,8,144], index: 2, kind: output, shape index: {}]  }
   0x1   :  { %1039 = sst [smem:[#allocation14_spill]] %s1030_s1 }
   0x2   :  { %7 = vsyncpa [#allocation3], 0 }
   0x3   :  { %9 = vsyncpa [#allocation3 + $0x1], 0 }
   0x4   :  { %10 = vsyncpa [#allocation6], 0 }
   0x5   :  { %11 = vsyncpa [#allocation4], 0 }
   0x6   :  { %13 = vsyncpa [#allocation4 + $0x1], 0  ;;  %s776_s9 = smov 0   ;;  %s778_s10 = smov 0  }
   0x7   :  { %s780_s11 = smov 0   ;;  %s782_s12 = smov 0  }
   0x8   :  { %s784_s13 = smov 0   ;;  %s786_s14 = smov 0  }
   0x9   :  { %s788_s15 = smov 0   ;;  %s790_s16 = smov 0  }
   0xa LB: > { %1040 = sst [smem:[#allocation11_spill]] %s738_s14  ;;  %s465_s17 = sadd.s32 4294967295, %s746_s16   ;;  %s746_s16 = sphi %s790_s16, %s19_s16   ;;  %s742_s15 = sphi %s788_s15, %s1065_s15   ;;  %s738_s14 = sphi %s786_s14, %s1059_s14   ;;  %s734_s13 = sphi %s784_s13, %s1064_s13   ;;  %s730_s12 = sphi %s782_s12, %s1058_s12   ;;  %s726_s11 = sphi %s780_s11, %s1063_s11   ;;  %s722_s10 = sphi %s778_s10, %s1062_s10   ;;  %s718_s9 = sphi %s776_s9, %s1061_s9  }
   0xb   : > { %s466_s18 = sadd.s32 4294967294, %s746_s16   ;;  %p53_p0 = scmp.ne.s32.totalorder %s722_s10, %s718_s9 }
   0xc   : > { %p820_p1 = scmp.eq.s32.totalorder %s465_s17, 0  ;;  %p824_p2 = scmp.eq.s32.totalorder %s465_s17, 3 }
   0xd   : > { %p106_p3 = scmp.eq.s32.totalorder %s466_s18, 3  ;;  %p467_p5 = scmp.ge.s32.totalorder %s746_s16, 1 }
   0xe   : > { %s1041_s19 = scalar_select %p820_p1, 1, 0 }
   0xf   : > { %s1042_s20 = scalar_select %p824_p2, 1, 0 }
  0x10   : > { %p830_p4 = por %p820_p1, %p53_p0  ;;  %p835_p6 = por %p106_p3, %p53_p0 }
  0x11   : > { %p113_p7 = scmp.lt.s32.totalorder %s746_s16, 5  ;;  %s748_s24 = smov [#allocation5]  }
  0x12   : > { %s1043_s21 = scalar_select %p830_p4, 1, 0 }
  0x13   : > { %s1044_s22 = scalar_select %p835_p6, 1, 0 }
  0x14   : > { %p840_p8 = pnand %p467_p5, %p113_p7  ;;  %s126_s25 = sshll.u32 %s748_s24, 4  ;;  %s127_s25 = int_to_ptr.vmem [resolvable:$true] %s126_s25 }
  0x15   : > { %s28_s27 = sadd.s32 1, %s738_s14  ;;  %s1047_s1 = sld [smem:[#allocation14_spill]] }
  0x16   : > { %s1045_s23 = scalar_select %p840_p8, 1, 0 }
  0x17   : > { %p494_p9 = pneg %p840_p8 }
  0x19   : > { %p848_p10 = pnand %p494_p9, %p820_p1 }
  0x1b   : > { %s586_s30 = scalar_lea.hbm %s1047_s1, 64  ;;  %p588_p12 = pneg %p848_p10 }
  0x1c   : > { %p587_p11 = scmp.ne.s32.totalorder %s1047_s1, %s586_s30  ;;  %p593_p3 = scmp.lt.u32.totalorder %s586_s30, %s1047_s1 }
  0x1e   : > { %p589_p13 = pnand %p588_p12, %p587_p11 }
  0x20   : > { %p590_p0 = pneg %p589_p13 }
  0x22   : > { %p595_p5 = pnand %p593_p3, %p590_p0 }
  0x24   : > { %598 = shalt.err (!%p595_p5)
}
  0x25   : > { %s599_s7 = scalar_lea.vmem %s127_s25, 64  ;;  %p607_p1 = scmp.lt.s32.totalorder %s127_s25, %s127_s25 }
  0x26   : > { %p600_p7 = scmp.ne.s32.totalorder %s127_s25, %s599_s7  ;;  %p608_p4 = scmp.lt.s32.totalorder %s599_s7, %s599_s7 }
  0x28   : > { %p602_p9 = pnand %p600_p7, %p588_p12  ;;  %p609_p8 = por %p608_p4, %p607_p1 }
  0x2a   : > { %p603_p6 = pneg %p602_p9 }
  0x2c   : > { %p610_p2 = pnand %p609_p8, %p603_p6 }
  0x2e   : > { %613 = shalt.err (!%p610_p2)
}
  0x2f   : > { %497 = dma.hbm_to_vmem [thread:$0]  (!%p848_p10), %s1047_s1, 64, %s127_s25, [#allocation6]  }
  0x30   : > { %p29_p1 = scmp.ge.s32.totalorder %s28_s27, 2  ;;  %s31_s18 = sadd.s32 1, %s742_s15 }
  0x31   : > { %s40_s24 = sadd.s32 1, %s726_s11  ;;  %p47_p2 = scmp.ne.s32.totalorder %s726_s11, %s722_s10 }
  0x32   : > { %s1067_s27 = smov (%p29_p1, %s28_s27), 0  ;;  %s1069_s18 = smov (!%p29_p1, %s31_s18), %s742_s15 }
  0x33   : > { %1048 = sst [smem:[#allocation12_spill]] %s1067_s27  ;;  %s36_s26 = ssub.s32 %s738_s14, %s1067_s27 }
  0x34   : > { %p48_p4 = scmp.eq.s32.totalorder %s746_s16, 0  ;;  %p33_p6 = scmp.ge.s32.totalorder %s1069_s18, 2 }
  0x35   : > { %p1049_p8 = scmp.ne.s32.totalorder %s1042_s20, 0  ;;  %p507_p12 = scmp.lt.s32.totalorder %s746_s16, 4 }
  0x36   : > { %p885_p10 = por %p48_p4, %p47_p2  ;;  %s1071_s18 = smov (%p33_p6, %s1069_s18), 0 }
  0x37   : > { %p881_p11 = por %p1049_p8, %p47_p2  ;;  %1052 = sst [smem:[#allocation13_spill]] %s1071_s18 }
  0x38   : > { %s137_s29 = sand.u32 1, %s726_s11   ;;  %s471_s30 = sshll.u32 %s738_s14, 1 }
  0x39   : > { %s35_s3 = ssub.s32 %s742_s15, %s1071_s18  ;;  %s470_s5 = sshll.u32 %s137_s29, 2 }
  0x3a   : > { %s37_s4 = sor.u32 %s36_s26, %s35_s3  ;;  %s472_s20 = sshll.u32 %s742_s15, 2 }
  0x3b   : > { %p38_p13 = scmp.eq.s32.totalorder %s37_s4, 0  ;;  %s141_s6 = scalar_lea.vmem [#allocation2], %s470_s5 }
  0x3c   : > { %s151_s7 = sshll.u32 %s141_s6, 4  ;;  %s147_s17 = sadd.s32 %s472_s20, %s471_s30  ;;  %s900_s7 = int_to_ptr.vmem [resolvable:$true] %s151_s7 }
  0x3d   : > { %s898_s8 = scalar_select %p38_p13, %s726_s11, %s40_s24  }
  0x3e   : > { %s473_s1 = sshll.u32 %s147_s17, 5  ;;  %p906_p0 = pnand %p507_p12, %p885_p10 }
  0x3f   : > { %s913_s26 = scalar_lea.hbm %s1029_s0, %s473_s1  ;;  %s138_s24 = scalar_lea.sflag [#allocation3], %s137_s29 }
  0x40   : > { %s614_s30 = scalar_lea.hbm %s913_s26, 64  ;;  %p616_p5 = pneg %p906_p0 }
  0x41   : > { %p615_p3 = scmp.ne.s32.totalorder %s913_s26, %s614_s30  ;;  %s619_s14 = scalar_lea.hbm %s1029_s0, 256 }
  0x42   : > { %p620_p1 = scmp.lt.u32.totalorder %s913_s26, %s1029_s0  ;;  %p621_p2 = scmp.lt.u32.totalorder %s619_s14, %s614_s30 }
  0x43   : > { %p617_p7 = pnand %p616_p5, %p615_p3  ;;  %p623_p6 = scmp.lt.u32.totalorder %s614_s30, %s913_s26 }
  0x44   : > { %p622_p4 = por %p621_p2, %p620_p1 }
  0x45   : > { %p618_p9 = pneg %p617_p7 }
  0x46   : > { %p624_p8 = por %p623_p6, %p622_p4 }
  0x48   : > { %p625_p10 = pnand %p624_p8, %p618_p9 }
  0x4a   : > { %628 = shalt.err (!%p625_p10)
}
  0x4b   : > { %s629_s29 = scalar_lea.vmem %s900_s7, 64  ;;  %s749_s4 = smov [#allocation2]  }
  0x4c   : > { %p630_p12 = scmp.ne.s32.totalorder %s900_s7, %s629_s29  ;;  %s634_s5 = sshll.u32 %s749_s4, 4  ;;  %s635_s5 = int_to_ptr.vmem [resolvable:$false] %s634_s5 }
  0x4d   : > { %s636_s20 = scalar_lea.vmem %s635_s5, 128  ;;  %p637_p7 = scmp.lt.s32.totalorder %s900_s7, %s635_s5 }
  0x4e   : > { %p632_p13 = pnand %p630_p12, %p616_p5  ;;  %p638_p1 = scmp.lt.s32.totalorder %s636_s20, %s629_s29 }
  0x50   : > { %p633_p3 = pneg %p632_p13  ;;  %p639_p2 = por %p638_p1, %p637_p7 }
  0x52   : > { %p640_p4 = pnand %p639_p2, %p633_p3 }
  0x54   : > { %643 = shalt.err (!%p640_p4)
}
  0x55   : > { %501 = dma.hbm_to_vmem [thread:$0]  (!%p906_p0), %s913_s26, 64, %s900_s7, %s138_s24  }
  0x56   : > { %p1054_p9 = scmp.ne.s32.totalorder %s1045_s23, 0 }
  0x57   : > { %s943_s6 = sand.u32 (!%p1054_p9), 1, %s722_s10   ;;  %p1055_p5 = scmp.ne.s32.totalorder (!%p1054_p9), %s1043_s21, 0 }
  0x58   : > { %160 = sbr.rel (%p1054_p9) target bundleno = 484 (0x1e4), region = 28  ;;  %s475_s17 = sshll.u32 (!%p1054_p9), %s943_s6, 2 }
  0x59   : > { %s163_s30 = scalar_lea.sflag (!%p1054_p9), [#allocation3], %s943_s6  ;;  %s166_s25 = scalar_lea.vmem (!%p1054_p9), [#allocation2], %s475_s17 }
  0x5f   : > { %705 = dma.done.wait (%p1055_p5), %s163_s30, 64  }
  0x60   : > { %707 = vsyncadd (%p1055_p5), %s163_s30, 4294967232  ;;  %p1056_p6 = scmp.ne.s32.totalorder %s1041_s19, 0 }
  0x62   : > { %709 = dma.done.wait (%p1056_p6), [#allocation6], 64  }
  0x63   : > { %711 = vsyncadd (%p1056_p6), [#allocation6], 4294967232  ;;  %v197_v0 = vlaneseq  ;;  %v750_v1 = vmov 1983009808   ;;  %v192_v6 = vld [vmem:[%s166_s25] sm:$0xf] }
  0x64   : > { %v195_v2 = vunpack.c.l.s4 %v750_v1  ;;  %v202_v8 = vcombine.low %v192_v6, %v192_v6  ;;  %s751_s23 = smov 109   ;;  %s752_s27 = smov 126   ;;  %v756_v14 = vmov 0   ;;  %vm215_vm0 = vcmask 1039360   ;;  %v296_v52 = vld [vmem:[#allocation5] sm:$0xf] }
  0x65   : > { %v198_v3 = vshrl.u32 %v197_v0, 7  ;;  %s753_s21 = smov 127   ;;  %s754_s19 = smov 110   ;;  %339 = vmatprep.mubr.bf16.mxu0 %v756_v14  ;;  %vm261_vm1 = vcmask 1041408   ;;  %vm268_vm2 = vcmask 1043456   ;;  %vm273_vm3 = vcmask 1045504  }
  0x66   : > { %v196_v4 = vunpack.c.0.s8 %v195_v2  ;;  %s755_s7 = smov 108   ;;  %s757_s26 = smov 92   ;;  %vm222_vm4 = vcmask 1031168   ;;  %vm229_vm5 = vcmask 900096   ;;  %vm241_vm6 = vcmask 883712  }
  0x67   : > { %s758_s24 = smov 91   ;;  %s759_s3 = smov 90   ;;  %vm247_vm7 = vcmask 752640   ;;  %vm235_vm8 = vcmask 891904   ;;  %vm253_vm9 = vcmask 744448   ;;  %vm259_vm10 = vcmask 736256  }
  0x68   : > { %v199_v5 = vsub.s32 %v196_v4, %v198_v3  ;;  %vm297_vm11 = vcmask 293888   ;;  %s477_s14 = sshll.u32 %s943_s6, 4  ;;  %s481_s18 = sshll.u32 %s730_s12, 1  ;;  %vm349_vm12 = vcmask 130048  }
  0x69   : > { %s482_s1 = sshll.u32 %s734_s13, 2  ;;  %s190_s4 = scalar_lea.vmem [#allocation7], %s477_s14 }
  0x6a   : > { %v200_v7 = vrot.slane %v192_v6, %v199_v5  ;;  %v209_v9 = vrot.slane %v202_v8, %v199_v5  ;;  %s364_s29 = sadd.s32 %s482_s1, %s481_s18  ;;  %s368_s5 = sshll.u32 %s190_s4, 4  ;;  %s972_s5 = int_to_ptr.vmem [resolvable:$true] %s368_s5 }
  0x6b   : > { %s483_s20 = sshll.u32 %s364_s29, 7  ;;  %s352_s12 = scalar_lea.sflag [#allocation4], %s943_s6 }
  0x6c   : > { %231 = vrot.lane.b32.xlu0 %v200_v7, %s751_s23  ;;  %220 = vrot.lane.b32.xlu1 %v200_v7, %s752_s27  ;;  %v217_v10 = vcombine.low %v200_v7, %v200_v7  ;;  %v210_v11 = vcombine.high %v209_v9, %v209_v9  ;;  %v224_v12 = vcombine.low %v209_v9, %v209_v9  ;;  %s977_s25 = scalar_lea.hbm %s1031_s2, %s483_s20  ;;  %s644_s13 = scalar_lea.vmem %s972_s5, 256 }
  0x6d   : > { %v201_v13 = vcombine.high %v200_v7, %v200_v7  ;;  %p645_p0 = scmp.ne.s32.totalorder %s972_s5, %s644_s13 }
  0x6f   : > { %p646_p8 = pnand %p645_p0, %p881_p11 }
  0x70   : > { %211 = vrot.lane.b32.xlu0 %v209_v9, %s753_s21  ;;  %218 = vrot.lane.b32.xlu1 %v217_v10, %s752_s27 }
  0x71   : > { %p647_p10 = pneg %p646_p8 }
  0x74   : > { %213 = vrot.lane.b32.xlu0 %v210_v11, %s753_s21  ;;  %227 = vrot.lane.b32.xlu1 %v209_v9, %s754_s19 }
  0x78   : > { %225 = vrot.lane.b32.xlu0 %v224_v12, %s754_s19  ;;  %233 = vrot.lane.b32.xlu1 %v201_v13, %s751_s23  ;;  %s760_s23 = smov [#allocation7]  }
  0x79   : > { %s648_s27 = sshll.u32 %s760_s23, 4  ;;  %s649_s27 = int_to_ptr.vmem [resolvable:$false] %s648_s27 }
  0x7a   : > { %s650_s21 = scalar_lea.vmem %s649_s27, 512  ;;  %p651_p12 = scmp.lt.s32.totalorder %s972_s5, %s649_s27 }
  0x7b   : > { %p652_p13 = scmp.lt.s32.totalorder %s650_s21, %s644_s13 }
  0x7c   : > { %237 = vrot.lane.b32.xlu0 %v209_v9, %s755_s7  ;;  %239 = vrot.lane.b32.xlu1 %v210_v11, %s755_s7 }
  0x7d   : > { %p653_p3 = por %p652_p13, %p651_p12 }
  0x7f   : > { %p654_p7 = pnand %p653_p3, %p647_p10 }
  0x80   : > { %243 = vrot.lane.b32.xlu0 %v217_v10, %s757_s26  ;;  %245 = vrot.lane.b32.xlu1 %v200_v7, %s757_s26 }
  0x84   : > { %249 = vrot.lane.b32.xlu0 %v224_v12, %s758_s24  ;;  %251 = vrot.lane.b32.xlu1 %v209_v9, %s758_s24 }
  0x88   : > { %255 = vrot.lane.b32.xlu0 %v200_v7, %s759_s3  ;;  %257 = vrot.lane.b32.xlu1 %v201_v13, %s759_s3 }
  0xde   : > { %v232_v15 = vpop.permute.xlu0 %231  ;;  %v221_v16 = vpop.permute.xlu1 %220 }
  0xe2   : > { %v212_v17 = vpop.permute.xlu0 %211  ;;  %v219_v18 = vpop.permute.xlu1 %218 }
  0xe3   : > { %v223_v26 = vsel %vm222_vm4, %v219_v18, %v221_v16 }
  0xe6   : > { %v214_v19 = vpop.permute.xlu0 %213  ;;  %v228_v20 = vpop.permute.xlu1 %227 }
  0xe7   : > { %v216_v21 = vsel %vm215_vm0, %v212_v17, %v214_v19  ;;  %v267_v22 = vsel %vm261_vm1, %v201_v13, %v214_v19 }
  0xe8   : > { %v264_v23 = vsel %vm261_vm1, %v200_v7, %v216_v21  ;;  %v272_v24 = vsel %vm268_vm2, %v267_v22, %v221_v16 }
  0xe9   : > { %v278_v25 = vsel %vm273_vm3, %v272_v24, %v228_v20  ;;  %v270_v30 = vsel %vm268_vm2, %v264_v23, %v223_v26 }
  0xea   : > { %v226_v27 = vpop.permute.xlu0 %225  ;;  %v234_v28 = vpop.permute.xlu1 %233  ;;  %307 = vmatprep.subr.bf16.mxu0 %v278_v25 }
  0xeb   : > { %v230_v29 = vsel %vm229_vm5, %v226_v27, %v228_v20  ;;  %v236_v38 = vsel %vm235_vm8, %v232_v15, %v234_v28 }
  0xec   : > { %v275_v31 = vsel %vm273_vm3, %v270_v30, %v230_v29 }
  0xed   : > { %308 = vmatpush1.bf16.msra.mxu0 %v275_v31 }
  0xee   : > { %v238_v32 = vpop.permute.xlu0 %237  ;;  %v240_v33 = vpop.permute.xlu1 %239 }
  0xef   : > { %v242_v36 = vsel %vm241_vm6, %v238_v32, %v240_v33  ;;  %v285_v39 = vsel %vm261_vm1, %v234_v28, %v240_v33 }
  0xf0   : > { %v282_v40 = vsel %vm261_vm1, %v236_v38, %v242_v36 }
  0xf2   : > { %v244_v34 = vpop.permute.xlu0 %243  ;;  %v246_v35 = vpop.permute.xlu1 %245 }
  0xf3   : > { %v248_v37 = vsel %vm247_vm7, %v244_v34, %v246_v35  ;;  %v289_v41 = vsel %vm268_vm2, %v285_v39, %v246_v35 }
  0xf4   : > { %v287_v46 = vsel %vm268_vm2, %v282_v40, %v248_v37 }
  0xf6   : > { %v250_v42 = vpop.permute.xlu0 %249  ;;  %v252_v43 = vpop.permute.xlu1 %251 }
  0xf7   : > { %v254_v44 = vsel %vm253_vm9, %v250_v42, %v252_v43  ;;  %v294_v45 = vsel %vm273_vm3, %v289_v41, %v252_v43 }
  0xf8   : > { %309 = vmatprep.subr.bf16.mxu0 %v294_v45  ;;  %v291_v47 = vsel %vm273_vm3, %v287_v46, %v254_v44 }
  0xf9   : > { %310 = vmatpush1.bf16.msra.mxu0 %v291_v47 }
  0xfa   : > { %v256_v48 = vpop.permute.xlu0 %255  ;;  %v258_v49 = vpop.permute.xlu1 %257 }
  0xfb   : > { %v260_v50 = vsel %vm259_vm10, %v256_v48, %v258_v49  ;;  %478 = vmatprep.subr.msk.bf16.mxu0 %vm261_vm1, %v258_v49 }
  0xfc   : > { %v302_v51 = vsel %vm261_vm1, %v260_v50, 0 }
  0xfd   : > { %312 = vmatpush1.bf16.msra.mxu0 %v302_v51 }
 0x100   : > { %479 = vmatmul.mubr.msk.bf16.vlgmr.msra.gmra.mrb[0].mxu0 %vm297_vm11, %v296_v52 }
 0x1d3   : > { %v341_v53 = vpop.f32.mrb[0].mxu0 }
 0x1d4   : > { %348 = vst [vmem:[%s190_s4] sm:$0xff] %v341_v53  ;;  %v343_v54 = vpop.f32.mrb[1].mxu0 }
 0x1d5   : > { %350 = vst.msk [vmem:[%s190_s4 + $0x8] sm:$0xff] %vm349_vm12, %v343_v54  ;;  %v345_v55 = vpop.f32.mrb[2].mxu0 }
 0x1d6   : > { %v346_v56 = vpop.f32.mrb[3].mxu0 }
 0x1d7   : > { %657 = shalt.err (!%p654_p7)
}
 0x1d8   : > { %s658_s6 = scalar_lea.hbm %s977_s25, 256  ;;  %s662_s26 = scalar_lea.hbm %s1031_s2, 1024 }
 0x1d9   : > { %p659_p1 = scmp.ne.s32.totalorder %s977_s25, %s658_s6  ;;  %p663_p9 = scmp.lt.u32.totalorder %s977_s25, %s1031_s2 }
 0x1da   : > { %p664_p5 = scmp.lt.u32.totalorder %s662_s26, %s658_s6  ;;  %p666_p0 = scmp.lt.u32.totalorder %s658_s6, %s977_s25 }
 0x1db   : > { %p660_p2 = pnand %p659_p1, %p881_p11 }
 0x1dc   : > { %p665_p6 = por %p664_p5, %p663_p9 }
 0x1dd   : > { %p661_p4 = pneg %p660_p2 }
 0x1de   : > { %p667_p8 = por %p666_p0, %p665_p6 }
 0x1e0   : > { %p668_p10 = pnand %p667_p8, %p661_p4 }
 0x1e2   : > { %671 = shalt.err (!%p668_p10)
}
 0x1e3   : > { %492 = dma.vmem_to_hbm [thread:$0]  (%p881_p11), %s972_s5, 256, %s977_s25, %s352_s12  }
 0x1e4 PF: > { %p509_p12 = scmp.ge.s32.totalorder %s746_s16, 2  ;;  %s380_s14 = sand.u32 1, %s718_s9  }
 0x1e5   : > { %p1057_p13 = scmp.ne.s32.totalorder %s1044_s22, 0  ;;  %s381_s18 = scalar_lea.sflag [#allocation4], %s380_s14 }
 0x1e7   : > { %p503_p3 = pnand %p509_p12, %p1057_p13 }
 0x1e9   : > { %713 = dma.done.wait (!%p503_p3), %s381_s18, 256  }
 0x1ea   : > { %715 = vsyncadd (!%p503_p3), %s381_s18, 4294967040  ;;  %s19_s16 = sadd.s32 1, %s746_s16   ;;  %s1058_s12 = sld [smem:[#allocation11_spill]] }
 0x1eb   : > { %p16_p7 = scmp.ge.s32.totalorder %s19_s16, 6   ;;  %s1059_s14 = sld [smem:[#allocation12_spill]] }
 0x1ec   : > { %s1060_s28 = sld [smem:[#allocation13_spill]]  ;;  %s1061_s9 = smov %s722_s10 }
 0x1ed   : > { %s1062_s10 = smov %s726_s11  ;;  %s1063_s11 = smov %s898_s8 }
 0x1ee   : > { %s1064_s13 = smov %s742_s15  ;;  %18 = sbr.rel (!%p16_p7) target bundleno = 10 (0xa), region = 77 }
 0x1f2   : > { %s1065_s15 = smov %s1060_s28 }
 0x1f5   :  { %386 = vsyncpa [#allocation3], 1 }
 0x1f6   :  { %388 = vsyncpa [#allocation3 + $0x1], 1 }
 0x1f7   :  { %389 = vsyncpa [#allocation6], 1 }
 0x1f8   :  { %390 = vsyncpa [#allocation4], 1 }
 0x1f9   :  { %392 = vsyncpa [#allocation4 + $0x1], 1 }

</bundles_post_ra>
